<compile_context>
chip_gen: v6e
topology: v6e:2x2x1
jax: 0.10.0
libtpu: 0.0.40
codegen_flags: <defaults>
</compile_context>

<pallas_src>
import jax
import jax.numpy as jnp
from jax.experimental import pallas as pl
from jax.experimental.pallas import tpu as pltpu


def _round_up(x, m):
    return ((x + m - 1) // m) * m


def _attention_kernel(lens_ref, q_ref, k_ref, v_ref, ctx_ref, wv_ref, en_ref):
    q = q_ref[...]                 # (TB, 1, D) f32
    k = k_ref[...]                 # (TB, S, D) f32
    v = v_ref[...]                 # (TB, S, D) f32
    lens = lens_ref[...]           # (TB, 1)    int32

    # --- dot similarity: reduce over the lane axis D -> (TB, S), S in lanes ---
    logits = jnp.sum(k * q, axis=-1)                               # (TB, S)

    # --- mask_: positions >= sequence_length get -inf (vectorized compare) ---
    pos = jax.lax.broadcasted_iota(jnp.int32, logits.shape, 1)     # (TB, S)
    logits = jnp.where(pos < lens, logits, -jnp.inf)

    # --- softmax over the sequence (lane) axis --------------------------------
    # Fully-masked rows produce energies == 0 (same as torch's
    # where(isnan, 0, softmax(all -inf))) without relying on NaN arithmetic.
    m = jnp.max(logits, axis=-1, keepdims=True)                    # (TB, 1)
    m_safe = jnp.where(m > -jnp.inf, m, 0.0)
    p = jnp.exp(logits - m_safe)                                   # (TB, S)
    denom = jnp.sum(p, axis=-1, keepdims=True)                     # (TB, 1)
    denom_safe = jnp.where(denom > 0.0, denom, 1.0)
    energies = jnp.where(denom > 0.0, p / denom_safe, 0.0)         # (TB, S)

    # --- weighted values + context vector -------------------------------------
    weighted = v * energies[:, :, None]                            # (TB, S, D)
    context = jnp.sum(weighted, axis=1)                            # (TB, D)

    ctx_ref[...] = context
    wv_ref[...] = weighted
    en_ref[...] = energies          # lane-dense (TB, S) store


def _choose_block_b(batch, seq, dim):
    """Largest TB (multiple of 8) whose double-buffered working set fits ~24 MiB."""
    # keys + values + weighted (the big three) + energies + q + ctx + lens, f32/i32,
    # times 2 for double buffering.
    bytes_per_row = 4 * (3 * seq * dim + seq + 2 * dim + 1) * 2
    budget = 24 * 1024 * 1024        # conservative for v7x's 64 MiB physical VMEM
    tb = max(8, min(budget // max(bytes_per_row, 1), 1024))
    tb = max(8, (tb // 8) * 8)
    return min(tb, _round_up(batch, 8))


def attention_forward(queries, keys, sequence_lengths, values=None, block_b=None):
    """Returns (context_vector (B,D), weighted_values (B,S,D), energies (B,S,1))."""
    # TODO(synk): only the default config (dot similarity, softmax normalization,
    # no query/key/value Linear transforms) is implemented in the kernel.
    if values is None:
        values = keys
    B, S, D = keys.shape

    # PyTorch dummy path for empty sequences (keys.size(1) == 0).
    if S == 0:
        return (jnp.zeros((B, D), jnp.float32),
                jnp.zeros((B, 1, D), jnp.float32),
                jnp.zeros((B, 1, 1), jnp.float32))

    queries = queries.astype(jnp.float32)
    keys = keys.astype(jnp.float32)
    values = values.astype(jnp.float32)

    tb = block_b if block_b is not None else _choose_block_b(B, S, D)
    b_pad = _round_up(B, tb)
    pad = b_pad - B

    q3 = queries.reshape(B, 1, D)
    lens = sequence_lengths.astype(jnp.int32).reshape(B, 1)
    if pad:
        q3 = jnp.pad(q3, ((0, pad), (0, 0), (0, 0)))
        keys_p = jnp.pad(keys, ((0, pad), (0, 0), (0, 0)))
        values_p = jnp.pad(values, ((0, pad), (0, 0), (0, 0)))
        lens = jnp.pad(lens, ((0, pad), (0, 0)))     # padded rows get length 0
    else:
        keys_p, values_p = keys, values

    grid = (b_pad // tb,)

    ctx, wv, en = pl.pallas_call(
        _attention_kernel,
        out_shape=(
            jax.ShapeDtypeStruct((b_pad, D), jnp.float32),      # context
            jax.ShapeDtypeStruct((b_pad, S, D), jnp.float32),   # weighted values
            jax.ShapeDtypeStruct((b_pad, S), jnp.float32),      # energies (lane-dense)
        ),
        grid=grid,
        in_specs=[
            pl.BlockSpec((tb, 1), lambda i: (i, 0)),            # sequence lengths
            pl.BlockSpec((tb, 1, D), lambda i: (i, 0, 0)),      # queries
            pl.BlockSpec((tb, S, D), lambda i: (i, 0, 0)),      # keys
            pl.BlockSpec((tb, S, D), lambda i: (i, 0, 0)),      # values
        ],
        out_specs=[
            pl.BlockSpec((tb, D), lambda i: (i, 0)),            # context
            pl.BlockSpec((tb, S, D), lambda i: (i, 0, 0)),      # weighted values
            pl.BlockSpec((tb, S), lambda i: (i, 0)),            # energies
        ],
        compiler_params=pltpu.CompilerParams(
            dimension_semantics=("parallel",),
            vmem_limit_bytes=32 * 1024 * 1024,
        ),
    )(lens, q3, keys_p, values_p)

    # Layout plumbing back to the PyTorch output shapes.
    return ctx[:B], wv[:B], en[:B].reshape(B, S, 1)


def attention_reference(queries, keys, sequence_lengths, values=None):
    """Pure-JAX reference mirroring the PyTorch forward (default config)."""
    if values is None:
        values = keys
    B, S, D = keys.shape
    logits = jnp.sum(queries[:, None, :] * keys, axis=-1)[..., None]     # (B,S,1)
    pos = jnp.arange(S)[None, :, None]
    logits = jnp.where(pos < sequence_lengths[:, None, None], logits, -jnp.inf)
    m = jnp.max(logits, axis=1, keepdims=True)
    p = jnp.exp(logits - m)
    energies = p / jnp.sum(p, axis=1, keepdims=True)
    energies = jnp.where(jnp.isnan(energies), 0.0, energies)
    weighted = values * energies
    context = jnp.sum(weighted, axis=1)
    return context, weighted, energies


if __name__ == "__main__":
    # Small deterministic inputs; lengths exercise full, partial and fully
    # masked rows (the latter hits the denom>0 guard / NaN-zeroing semantics).
    B, S, D = 3, 8, 32
    key = jax.random.PRNGKey(0)
    kq, kk = jax.random.split(key)
    queries = jax.random.normal(kq, (B, D), dtype=jnp.float32)
    keys = jax.random.normal(kk, (B, S, D), dtype=jnp.float32)
    seq_lens = jnp.array([8, 5, 0], dtype=jnp.int32)

    ctx, wv, en = attention_forward(queries, keys, seq_lens)
    jax.block_until_ready((ctx, wv, en))

    ctx_r, wv_r, en_r = attention_reference(queries, keys, seq_lens)
    assert ctx.shape == (B, D) and wv.shape == (B, S, D) and en.shape == (B, S, 1)
    assert jnp.allclose(ctx, ctx_r, atol=1e-5, rtol=1e-5)
    assert jnp.allclose(wv, wv_r, atol=1e-5, rtol=1e-5)
    assert jnp.allclose(en, en_r, atol=1e-5, rtol=1e-5)

    print("KERNEL_OK")
</pallas_src>

<mosaic_0001>
module attributes {stable_mosaic.version = 11 : i64} {
  func.func @_attention_kernel(%arg0: i32, %arg1: memref<8x1xi32, #tpu.memory_space<vmem>>, %arg2: memref<8x1x32xf32, #tpu.memory_space<vmem>>, %arg3: memref<8x8x32xf32, #tpu.memory_space<vmem>>, %arg4: memref<8x8x32xf32, #tpu.memory_space<vmem>>, %arg5: memref<8x32xf32, #tpu.memory_space<vmem>>, %arg6: memref<8x8x32xf32, #tpu.memory_space<vmem>>, %arg7: memref<8x8xf32, #tpu.memory_space<vmem>>) attributes {dimension_semantics = [#tpu.dimension_semantics<parallel>], iteration_bounds = array<i64: 1>, scalar_prefetch = 0 : i64, scratch_operands = 0 : i64, tpu.core_type = #tpu.core_type<tc>, window_params = [{transform_indices = @transform_0, window_bounds = array<i64: 8, 1>}, {transform_indices = @transform_1, window_bounds = array<i64: 8, 1, 32>}, {transform_indices = @transform_2, window_bounds = array<i64: 8, 8, 32>}, {transform_indices = @transform_3, window_bounds = array<i64: 8, 8, 32>}, {transform_indices = @transform_4, window_bounds = array<i64: 8, 32>}, {transform_indices = @transform_5, window_bounds = array<i64: 8, 8, 32>}, {transform_indices = @transform_6, window_bounds = array<i64: 8, 8>}]} {
    %c0 = arith.constant 0 : index
    %c0_0 = arith.constant 0 : index
    %c0_1 = arith.constant 0 : index
    %0 = vector.load %arg2[%c0, %c0_0, %c0_1] : memref<8x1x32xf32, #tpu.memory_space<vmem>>, vector<8x1x32xf32>
    %c0_2 = arith.constant 0 : index
    %c0_3 = arith.constant 0 : index
    %c0_4 = arith.constant 0 : index
    %1 = vector.load %arg3[%c0_2, %c0_3, %c0_4] : memref<8x8x32xf32, #tpu.memory_space<vmem>>, vector<8x8x32xf32>
    %c0_5 = arith.constant 0 : index
    %c0_6 = arith.constant 0 : index
    %c0_7 = arith.constant 0 : index
    %2 = vector.load %arg4[%c0_5, %c0_6, %c0_7] : memref<8x8x32xf32, #tpu.memory_space<vmem>>, vector<8x8x32xf32>
    %c0_8 = arith.constant 0 : index
    %c0_9 = arith.constant 0 : index
    %3 = vector.load %arg1[%c0_8, %c0_9] : memref<8x1xi32, #tpu.memory_space<vmem>>, vector<8x1xi32>
    %4 = vector.broadcast %0 : vector<8x1x32xf32> to vector<8x8x32xf32>
    %5 = arith.mulf %1, %4 : vector<8x8x32xf32>
    %cst = arith.constant dense<0.000000e+00> : vector<8x8xf32>
    %6 = vector.multi_reduction <add>, %5, %cst [2] : vector<8x8x32xf32> to vector<8x8xf32>
    %7 = tpu.iota {dimensions = array<i32: 1>} : vector<8x8xi32>
    %8 = vector.broadcast %3 : vector<8x1xi32> to vector<8x8xi32>
    %9 = arith.cmpi slt, %7, %8 : vector<8x8xi32>
    %cst_10 = arith.constant 0xFF800000 : f32
    %10 = vector.broadcast %cst_10 : f32 to vector<8x8xf32>
    %11 = arith.select %9, %6, %10 : vector<8x8xi1>, vector<8x8xf32>
    %cst_11 = arith.constant dense<0xFF800000> : vector<8xf32>
    %12 = vector.multi_reduction <maximumf>, %11, %cst_11 [1] : vector<8x8xf32> to vector<8xf32>
    %13 = vector.shape_cast %12 : vector<8xf32> to vector<8x1xf32>
    %cst_12 = arith.constant 0xFF800000 : f32
    %14 = vector.broadcast %cst_12 : f32 to vector<8x1xf32>
    %15 = arith.cmpf ogt, %13, %14 : vector<8x1xf32>
    %cst_13 = arith.constant 0.000000e+00 : f32
    %16 = vector.broadcast %cst_13 : f32 to vector<8x1xf32>
    %17 = arith.select %15, %13, %16 : vector<8x1xi1>, vector<8x1xf32>
    %18 = vector.broadcast %17 : vector<8x1xf32> to vector<8x8xf32>
    %19 = arith.subf %11, %18 : vector<8x8xf32>
    %20 = math.exp %19 : vector<8x8xf32>
    %cst_14 = arith.constant dense<0.000000e+00> : vector<8xf32>
    %21 = vector.multi_reduction <add>, %20, %cst_14 [1] : vector<8x8xf32> to vector<8xf32>
    %22 = vector.shape_cast %21 : vector<8xf32> to vector<8x1xf32>
    %cst_15 = arith.constant 0.000000e+00 : f32
    %23 = vector.broadcast %cst_15 : f32 to vector<8x1xf32>
    %24 = arith.cmpf ogt, %22, %23 : vector<8x1xf32>
    %cst_16 = arith.constant 1.000000e+00 : f32
    %25 = vector.broadcast %cst_16 : f32 to vector<8x1xf32>
    %26 = arith.select %24, %22, %25 : vector<8x1xi1>, vector<8x1xf32>
    %cst_17 = arith.constant 0.000000e+00 : f32
    %27 = vector.broadcast %cst_17 : f32 to vector<8x1xf32>
    %28 = arith.cmpf ogt, %22, %27 : vector<8x1xf32>
    %29 = vector.broadcast %26 : vector<8x1xf32> to vector<8x8xf32>
    %30 = arith.divf %20, %29 : vector<8x8xf32>
    %cst_18 = arith.constant 0.000000e+00 : f32
    %31 = vector.shape_cast %28 : vector<8x1xi1> to vector<8x1xi1>
    %32 = vector.broadcast %31 : vector<8x1xi1> to vector<8x8xi1>
    %33 = vector.broadcast %cst_18 : f32 to vector<8x8xf32>
    %34 = arith.select %32, %30, %33 : vector<8x8xi1>, vector<8x8xf32>
    %35 = vector.shape_cast %34 : vector<8x8xf32> to vector<8x8x1xf32>
    %36 = vector.broadcast %35 : vector<8x8x1xf32> to vector<8x8x32xf32>
    %37 = arith.mulf %2, %36 : vector<8x8x32xf32>
    %cst_19 = arith.constant dense<0.000000e+00> : vector<8x32xf32>
    %38 = vector.multi_reduction <add>, %37, %cst_19 [1] : vector<8x8x32xf32> to vector<8x32xf32>
    %c0_20 = arith.constant 0 : index
    %c0_21 = arith.constant 0 : index
    %39 = vector.load %arg5[%c0_20, %c0_21] : memref<8x32xf32, #tpu.memory_space<vmem>>, vector<8x32xf32>
    tpu.vector_store %arg5[%c0_20, %c0_21], %38 {strides = array<i32>} : memref<8x32xf32, #tpu.memory_space<vmem>>, vector<8x32xf32>,
    %c0_22 = arith.constant 0 : index
    %c0_23 = arith.constant 0 : index
    %c0_24 = arith.constant 0 : index
    %40 = vector.load %arg6[%c0_22, %c0_23, %c0_24] : memref<8x8x32xf32, #tpu.memory_space<vmem>>, vector<8x8x32xf32>
    tpu.vector_store %arg6[%c0_22, %c0_23, %c0_24], %37 {strides = array<i32>} : memref<8x8x32xf32, #tpu.memory_space<vmem>>, vector<8x8x32xf32>,
    %c0_25 = arith.constant 0 : index
    %c0_26 = arith.constant 0 : index
    %41 = vector.load %arg7[%c0_25, %c0_26] : memref<8x8xf32, #tpu.memory_space<vmem>>, vector<8x8xf32>
    tpu.vector_store %arg7[%c0_25, %c0_26], %34 {strides = array<i32>} : memref<8x8xf32, #tpu.memory_space<vmem>>, vector<8x8xf32>,
    return
  }
  func.func @transform_0(%arg0: i32) -> (i32, i32) {
    %c0_i32 = arith.constant 0 : i32
    %c0_i32_0 = arith.constant 0 : i32
    return %arg0, %c0_i32 : i32, i32
  }
  func.func @transform_1(%arg0: i32) -> (i32, i32, i32) {
    %c0_i32 = arith.constant 0 : i32
    %c0_i32_0 = arith.constant 0 : i32
    %c0_i32_1 = arith.constant 0 : i32
    return %arg0, %c0_i32, %c0_i32_0 : i32, i32, i32
  }
  func.func @transform_2(%arg0: i32) -> (i32, i32, i32) {
    %c0_i32 = arith.constant 0 : i32
    %c0_i32_0 = arith.constant 0 : i32
    %c0_i32_1 = arith.constant 0 : i32
    return %arg0, %c0_i32, %c0_i32_0 : i32, i32, i32
  }
  func.func @transform_3(%arg0: i32) -> (i32, i32, i32) {
    %c0_i32 = arith.constant 0 : i32
    %c0_i32_0 = arith.constant 0 : i32
    %c0_i32_1 = arith.constant 0 : i32
    return %arg0, %c0_i32, %c0_i32_0 : i32, i32, i32
  }
  func.func @transform_4(%arg0: i32) -> (i32, i32) {
    %c0_i32 = arith.constant 0 : i32
    %c0_i32_0 = arith.constant 0 : i32
    return %arg0, %c0_i32 : i32, i32
  }
  func.func @transform_5(%arg0: i32) -> (i32, i32, i32) {
    %c0_i32 = arith.constant 0 : i32
    %c0_i32_0 = arith.constant 0 : i32
    %c0_i32_1 = arith.constant 0 : i32
    return %arg0, %c0_i32, %c0_i32_0 : i32, i32, i32
  }
  func.func @transform_6(%arg0: i32) -> (i32, i32) {
    %c0_i32 = arith.constant 0 : i32
    %c0_i32_0 = arith.constant 0 : i32
    return %arg0, %c0_i32 : i32, i32
  }
}

</mosaic_0001>

<bundles_post_ra>
// kernel: tpu_custom_call.1
= control target key start
LH: loop header
LB: loop body
LE: loop exit
PB: predicated region body
PF: predicated region fallthrough
CT: control target
= control target key end

     0   :  { %12 = vsyncpa [#allocation3], 0  ;;  %s704_s0 = inlined_call_operand.vmem [shape: s32[8,1], index: 0, kind: input, shape index: {}]   ;;  %s705_s1 = inlined_call_operand.vmem [shape: f32[8,1,32], index: 1, kind: input, shape index: {}]   ;;  %s706_s2 = inlined_call_operand.hbm [shape: f32[8,8,32], index: 2, kind: input, shape index: {}]   ;;  %s707_s3 = inlined_call_operand.hbm [shape: f32[8,8,32], index: 3, kind: input, shape index: {}]   ;;  %s708_s4 = inlined_call_operand.hbm [shape: f32[8,32], index: 4, kind: output, shape index: {0}]   ;;  %s709_s5 = inlined_call_operand.hbm [shape: f32[8,8,32], index: 5, kind: output, shape index: {1}]   ;;  %s710_s6 = inlined_call_operand.hbm [shape: f32[8,8], index: 6, kind: output, shape index: {2}]  }
   0x1   :  { %13 = vsyncpa [#allocation6], 0 }
   0x2   :  { %14 = vsyncpa [#allocation4], 0 }
   0x3   :  { %15 = vsyncpa [#allocation9], 0  ;;  %s557_s21 = smov [#allocation2]  }
   0x4   :  { %s25_s22 = sshll.u32 %s557_s21, 4  ;;  %s26_s22 = int_to_ptr.vmem [resolvable:$true] %s25_s22 }
   0x5   :  { %s457_s23 = scalar_lea.vmem %s26_s22, 1024  ;;  %p462_p1 = scmp.lt.s32.totalorder %s26_s22, %s26_s22 }
   0x6   :  { %p458_p0 = scmp.ne.s32.totalorder %s26_s22, %s457_s23  ;;  %p463_p2 = scmp.lt.s32.totalorder %s457_s23, %s457_s23 }
   0x8   :  { %p464_p3 = por %p463_p2, %p462_p1 }
   0xa   :  { %p465_p4 = pnand %p464_p3, %p458_p0 }
   0xc   :  { %468 = shalt.err (!%p465_p4)
}
   0xd   :  { %s558_s24 = smov 128   ;;  %s559_s25 = smov 8  }
   0xe   :  { %31 = dma.hbm_to_vmem [thread:$0]  %s706_s2, 1024, %s26_s22, [#allocation3], %s558_s24, %s558_s24, %s559_s25  }
   0xf   :  { %s560_s28 = smov [#allocation5]  }
  0x10   :  { %s37_s29 = sshll.u32 %s560_s28, 4  ;;  %s38_s29 = int_to_ptr.vmem [resolvable:$true] %s37_s29 }
  0x11   :  { %s477_s30 = scalar_lea.vmem %s38_s29, 1024  ;;  %p482_p6 = scmp.lt.s32.totalorder %s38_s29, %s38_s29 }
  0x12   :  { %p478_p5 = scmp.ne.s32.totalorder %s38_s29, %s477_s30  ;;  %p483_p7 = scmp.lt.s32.totalorder %s477_s30, %s477_s30 }
  0x14   :  { %p484_p8 = por %p483_p7, %p482_p6 }
  0x16   :  { %p485_p9 = pnand %p484_p8, %p478_p5 }
  0x18   :  { %488 = shalt.err (!%p485_p9)
}
  0x19   :  { %43 = dma.hbm_to_vmem [thread:$0]  %s707_s3, 1024, %s38_s29, [#allocation6], %s558_s24, %s558_s24, %s559_s25  }
  0x1a   :  { %549 = dma.done.wait [#allocation3], 1024  }
  0x1b   :  { %550 = vsyncadd [#allocation3], 4294966272 }
  0x1c   :  { %551 = dma.done.wait [#allocation6], 1024  }
  0x1d   :  { %552 = vsyncadd [#allocation6], 4294966272  ;;  %v561_v0 = vmov 0   ;;  %v428_v1 = vld [vmem:[%s705_s1] ss:$0 sm:$0xff]  ;;  %vm131_vm0 = vcmask 261120   ;;  %v156_v34 = vlaneseq }
  0x1e   :  { %444 = vset.pattern.permute.xlu0 %v561_v0  ;;  %v58_v2 = vld [vmem:[#allocation2] sm:$0xff]  ;;  %v60_v5 = vld [vmem:[#allocation2 + $0x10] sm:$0xff]  ;;  %v59_v7 = vld [vmem:[#allocation2 + $0x8] sm:$0xff]  ;;  %vm202_vm1 = vcmask 1041409   ;;  %vm204_vm2 = vcmask 1042434   ;;  %vm206_vm3 = vcmask 1043459  }
  0x1f   :  { %v430_v3 = vld [vmem:[%s705_s1 + $0x2] ss:$0 sm:$0xff]  ;;  %v123_v4 = vmul.f32 %v428_v1, %v58_v2  ;;  %v429_v6 = vld [vmem:[%s705_s1 + $0x1] ss:$0 sm:$0xff]  ;;  %v431_v10 = vld [vmem:[%s705_s1 + $0x3] ss:$0 sm:$0xff] }
  0x20   :  { %v125_v8 = vmul.f32 %v430_v3, %v60_v5  ;;  %v124_v9 = vmul.f32 %v429_v6, %v59_v7  ;;  %v61_v11 = vld [vmem:[#allocation2 + $0x18] sm:$0xff]  ;;  %v432_v12 = vld [vmem:[%s705_s1 + $0x4] ss:$0 sm:$0xff]  ;;  %v433_v16 = vld [vmem:[%s705_s1 + $0x5] ss:$0 sm:$0xff]  ;;  %v157_v35 = vand.u32 127, %v156_v34 }
  0x21   :  { %v132_v13 = vsel %vm131_vm0, %v123_v4, 0.0  ;;  %v126_v14 = vmul.f32 %v431_v10, %v61_v11  ;;  %v62_v15 = vld [vmem:[#allocation2 + $0x20] sm:$0xff]  ;;  %v63_v17 = vld [vmem:[#allocation2 + $0x28] sm:$0xff]  ;;  %v64_v24 = vld [vmem:[#allocation2 + $0x30] sm:$0xff]  ;;  %v647_v36 = vshrl.u32 %v156_v34, 7  ;;  %vm208_vm4 = vcmask 1044484  }
  0x22   :  { %133 = vadd.xlane.f32.xlu0 %v132_v13  ;;  %v138_v18 = vsel %vm131_vm0, %v125_v8, 0.0  ;;  %v135_v19 = vsel %vm131_vm0, %v124_v9, 0.0  ;;  %v127_v20 = vmul.f32 %v432_v12, %v62_v15  ;;  %v128_v22 = vmul.f32 %v433_v16, %v63_v17  ;;  %v434_v23 = vld [vmem:[%s705_s1 + $0x6] ss:$0 sm:$0xff]  ;;  %v435_v25 = vld [vmem:[%s705_s1 + $0x7] ss:$0 sm:$0xff] }
  0x23   :  { %139 = vadd.xlane.f32.xlu1 %v138_v18  ;;  %v141_v21 = vsel %vm131_vm0, %v126_v14, 0.0  ;;  %v65_v26 = vld [vmem:[#allocation2 + $0x38] sm:$0xff]  ;;  %v129_v28 = vmul.f32 %v434_v23, %v64_v24  ;;  %v74_v33 = vld [vmem:[%s704_s0] sm:$0xff]  ;;  %v172_v38 = vsub.s32 %v157_v35, %v647_v36  ;;  %vm210_vm5 = vcmask 1045509   ;;  %s562_s0 = smov [#allocation8]   ;;  %s563_s27 = smov [#allocation10]  }
  0x24   :  { %v144_v27 = vsel %vm131_vm0, %v127_v20, 0.0  ;;  %v147_v29 = vsel %vm131_vm0, %v128_v22, 0.0  ;;  %v130_v30 = vmul.f32 %v435_v25, %v65_v26  ;;  %vm212_vm6 = vcmask 1046534   ;;  %s398_s1 = sshll.u32 %s562_s0, 4  ;;  %s411_s28 = sshll.u32 %s563_s27, 4  ;;  %s399_s1 = int_to_ptr.vmem [resolvable:$true] %s398_s1  ;;  %s412_s28 = int_to_ptr.vmem [resolvable:$true] %s411_s28 }
  0x25   :  { %v150_v31 = vsel %vm131_vm0, %v129_v28, 0.0  ;;  %vm214_vm7 = vcmask 1047559   ;;  %vm218_vm8 = vcmask 64512   ;;  %v281_v9 = vsub.s32 6, %v647_v36  ;;  %v66_v28 = vld [vmem:[#allocation5] sm:$0xff]  ;;  %s489_s29 = scalar_lea.vmem %s399_s1, 1024  ;;  %p494_p11 = scmp.lt.s32.totalorder %s399_s1, %s399_s1 }
  0x26   :  { %136 = vadd.xlane.f32.xlu0 %v135_v19  ;;  %v153_v32 = vsel %vm131_vm0, %v130_v30, 0.0  ;;  %v239_v10 = vsub.s32 0, %v647_v36  ;;  %v246_v15 = vsub.s32 1, %v647_v36  ;;  %v253_v17 = vsub.s32 2, %v647_v36  ;;  %p490_p10 = scmp.ne.s32.totalorder %s399_s1, %s489_s29  ;;  %p495_p12 = scmp.lt.s32.totalorder %s489_s29, %s489_s29 }
  0x27   :  { %142 = vadd.xlane.f32.xlu1 %v141_v21  ;;  %v260_v19 = vsub.s32 3, %v647_v36  ;;  %v267_v21 = vsub.s32 4, %v647_v36  ;;  %v274_v23 = vsub.s32 5, %v647_v36  ;;  %v288_v25 = vsub.s32 7, %v647_v36 }
  0x28   :  { %p496_p13 = por %p495_p12, %p494_p11 }
  0x2a   :  { %145 = vadd.xlane.f32.xlu0 %v144_v27  ;;  %v72_v27 = vld [vmem:[#allocation5 + $0x30] sm:$0xff]  ;;  %p497_p0 = pnand %p496_p13, %p490_p10 }
  0x2b   :  { %148 = vadd.xlane.f32.xlu1 %v147_v29 }
  0x2e   :  { %151 = vadd.xlane.f32.xlu0 %v150_v31 }
  0x2f   :  { %154 = vadd.xlane.f32.xlu1 %v153_v32 }
  0x44   :  { %159 = vperm.xlu0 %444, %v74_v33   ;;  %v67_v33 = vld [vmem:[#allocation5 + $0x8] sm:$0xff] }
  0xab   :  { %v134_v37 = vpop.xlane.xlu0 %133 }
  0xac   :  { %v140_v39 = vpop.xlane.xlu1 %139  ;;  %v173_v42 = vrot.slane %v134_v37, %v172_v38  ;;  %v68_v37 = vld [vmem:[#allocation5 + $0x10] sm:$0xff] }
  0xad   :  { %v181_v40 = vrot.slane %v140_v39, %v172_v38 }
  0xaf   :  { %v137_v41 = vpop.xlane.xlu0 %136 }
  0xb0   :  { %v177_v43 = vrot.slane %v137_v41, %v172_v38  ;;  %v143_v44 = vpop.xlane.xlu1 %142 }
  0xb1   :  { %v185_v46 = vrot.slane %v143_v44, %v172_v38 }
  0xb2   :  { %v203_v45 = vsel %vm202_vm1, %v177_v43, %v173_v42  ;;  %v69_v43 = vld [vmem:[#allocation5 + $0x18] sm:$0xff] }
  0xb3   :  { %v205_v47 = vsel %vm204_vm2, %v181_v40, %v203_v45  ;;  %v146_v48 = vpop.xlane.xlu0 %145 }
  0xb4   :  { %v149_v49 = vpop.xlane.xlu1 %148  ;;  %v189_v50 = vrot.slane %v146_v48, %v172_v38  ;;  %v207_v51 = vsel %vm206_vm3, %v185_v46, %v205_v47 }
  0xb5   :  { %v193_v53 = vrot.slane %v149_v49, %v172_v38 }
  0xb6   :  { %v209_v54 = vsel %vm208_vm4, %v189_v50, %v207_v51 }
  0xb7   :  { %v152_v52 = vpop.xlane.xlu0 %151  ;;  %v211_v57 = vsel %vm210_vm5, %v193_v53, %v209_v54 }
  0xb8   :  { %v197_v55 = vrot.slane %v152_v52, %v172_v38  ;;  %v155_v56 = vpop.xlane.xlu1 %154  ;;  %v70_v52 = vld [vmem:[#allocation5 + $0x20] sm:$0xff] }
  0xb9   :  { %v201_v58 = vrot.slane %v155_v56, %v172_v38 }
  0xba   :  { %v213_v59 = vsel %vm212_vm6, %v197_v55, %v211_v57 }
  0xbb   :  { %v215_v61 = vsel %vm214_vm7, %v201_v58, %v213_v59 }
  0xbf   :  { %v160_v60 = vpop.permute.xlu0 %159 }
  0xc0   :  { %vm161_vm9 = vcmp.lt.s32.totalorder %v157_v35, %v160_v60 }
  0xc1   :  { %v217_v62 = vsel %vm161_vm9, %v215_v61, -inf }
  0xc2   :  { %v219_v63 = vsel %vm218_vm8, %v217_v62, -inf }
  0xc3   :  { %220 = vmax.xlane.f32.xlu1 %v219_v63 }
 0x14c   :  { %v221_v0 = vpop.xlane.xlu1 %220 }
 0x14d   :  { %vm222_vm10 = vcmp.gt.f32.partialorder %v221_v0, -inf }
 0x14e   :  { %v223_v1 = vsel %vm222_vm10, %v221_v0, 0.0 }
 0x14f   :  { %v224_v2 = vsub.f32 %v217_v62, %v223_v1  ;;  %v71_v62 = vld [vmem:[#allocation5 + $0x28] sm:$0xff] }
 0x151   :  { %v225_v3 = vmul.f32 1.442695, %v224_v2 }
 0x153   :  { %445 = vpow2.f32 %v225_v3 }
 0x160   :  { %v446_v4 = vpop.eup %445 }
 0x161   :  { %v227_v5 = vsel %vm218_vm8, %v446_v4, 0.0 }
 0x162   :  { %228 = vadd.xlane.f32.xlu1 %v227_v5 }
 0x1eb   :  { %v229_v6 = vpop.xlane.xlu1 %228 }
 0x1ec   :  { %vm230_vm11 = vcmp.gt.f32.partialorder %v229_v6, 0.0 }
 0x1ed   :  { %v231_v7 = vsel %vm230_vm11, %v229_v6, 1.0 }
 0x1ee   :  { %447 = vrcp.f32 %v231_v7 }
 0x1fb   :  { %v448_v8 = vpop.eup %447 }
 0x1fc   :  { %v233_v11 = vmul.f32 %v448_v8, %v446_v4 }
 0x1fe   :  { %v236_v12 = vsel %vm230_vm11, %v233_v11, 0.0 }
 0x1ff   :  { %382 = vst.msk [vmem:[#allocation10] sm:$0xff] %vm218_vm8, %v236_v12  ;;  %v282_v13 = vrot.slane %v236_v12, %v281_v9  ;;  %v240_v14 = vrot.slane %v236_v12, %v239_v10  ;;  %v247_v16 = vrot.slane %v236_v12, %v246_v15  ;;  %v254_v18 = vrot.slane %v236_v12, %v253_v17  ;;  %v73_v10 = vld [vmem:[#allocation5 + $0x38] sm:$0xff] }
 0x200   :  { %v261_v20 = vrot.slane %v236_v12, %v260_v19  ;;  %v268_v22 = vrot.slane %v236_v12, %v267_v21  ;;  %v275_v24 = vrot.slane %v236_v12, %v274_v23  ;;  %v289_v26 = vrot.slane %v236_v12, %v288_v25 }
 0x201   :  { %284 = vbcast.lane.b32.xlu0 %v282_v13, 256  ;;  %242 = vbcast.lane.b32.xlu1 %v240_v14, 256 }
 0x205   :  { %249 = vbcast.lane.b32.xlu1 %v247_v16, 256 }
 0x209   :  { %256 = vbcast.lane.b32.xlu1 %v254_v18, 256 }
 0x20d   :  { %263 = vbcast.lane.b32.xlu1 %v261_v20, 256 }
 0x211   :  { %270 = vbcast.lane.b32.xlu1 %v268_v22, 256 }
 0x215   :  { %277 = vbcast.lane.b32.xlu1 %v275_v24, 256 }
 0x219   :  { %291 = vbcast.lane.b32.xlu1 %v289_v26, 256 }
 0x273   :  { %v285_v29 = vpop.permute.xlu0 %284  ;;  %v243_v30 = vpop.permute.xlu1 %242 }
 0x274   :  { %v299_v31 = vmul.f32 %v285_v29, %v72_v27  ;;  %v293_v32 = vmul.f32 %v243_v30, %v66_v28 }
 0x276   :  { %380 = vst.msk [vmem:[#allocation8 + $0x30] sm:$0xff] %vm131_vm0, %v299_v31  ;;  %374 = vst.msk [vmem:[#allocation8] sm:$0xff] %vm131_vm0, %v293_v32  ;;  %v301_v38 = vsel %vm131_vm0, %v293_v32, 0.0  ;;  %v343_v49 = vsel %vm131_vm0, %v299_v31, 0.0 }
 0x277   :  { %v250_v34 = vpop.permute.xlu1 %249  ;;  %v302_v42 = vrot.slane %v301_v38, 4  ;;  %v344_v57 = vrot.slane %v343_v49, 4 }
 0x278   :  { %v294_v35 = vmul.f32 %v250_v34, %v67_v33 }
 0x279   :  { %v303_v50 = vadd.f32 %v302_v42, %v301_v38  ;;  %v345_v4 = vadd.f32 %v344_v57, %v343_v49 }
 0x27a   :  { %v308_v36 = vsel %vm131_vm0, %v294_v35, 0.0  ;;  %375 = vst.msk [vmem:[#allocation8 + $0x8] sm:$0xff] %vm131_vm0, %v294_v35 }
 0x27b   :  { %v309_v39 = vrot.slane %v308_v36, 4  ;;  %v257_v40 = vpop.permute.xlu1 %256  ;;  %v304_v60 = vrot.slane %v303_v50, 2  ;;  %v346_v16 = vrot.slane %v345_v4, 2 }
 0x27c   :  { %v295_v41 = vmul.f32 %v257_v40, %v68_v37 }
 0x27d   :  { %v310_v45 = vadd.f32 %v309_v39, %v308_v36  ;;  %v305_v7 = vadd.f32 %v304_v60, %v303_v50 }
 0x27e   :  { %v315_v44 = vsel %vm131_vm0, %v295_v41, 0.0  ;;  %376 = vst.msk [vmem:[#allocation8 + $0x10] sm:$0xff] %vm131_vm0, %v295_v41 }
 0x27f   :  { %v316_v46 = vrot.slane %v315_v44, 4  ;;  %v264_v47 = vpop.permute.xlu1 %263  ;;  %v311_v54 = vrot.slane %v310_v45, 2  ;;  %v306_v19 = vrot.slane %v305_v7, 1 }
 0x280   :  { %v296_v48 = vmul.f32 %v264_v47, %v69_v43 }
 0x281   :  { %v317_v51 = vadd.f32 %v316_v46, %v315_v44  ;;  %v312_v0 = vadd.f32 %v311_v54, %v310_v45 }
 0x282   :  { %v322_v53 = vsel %vm131_vm0, %v296_v48, 0.0  ;;  %377 = vst.msk [vmem:[#allocation8 + $0x18] sm:$0xff] %vm131_vm0, %v296_v48 }
 0x283   :  { %v323_v55 = vrot.slane %v322_v53, 4  ;;  %v271_v56 = vpop.permute.xlu1 %270  ;;  %v318_v58 = vrot.slane %v317_v51, 2  ;;  %v313_v12 = vrot.slane %v312_v0, 1 }
 0x284   :  { %v297_v59 = vmul.f32 %v271_v56, %v70_v52 }
 0x285   :  { %v324_v61 = vadd.f32 %v323_v55, %v322_v53  ;;  %v319_v5 = vadd.f32 %v318_v58, %v317_v51  ;;  %v314_v24 = vadd.f32 %v313_v12, %v312_v0 }
 0x286   :  { %v329_v63 = vsel %vm131_vm0, %v297_v59, 0.0  ;;  %378 = vst.msk [vmem:[#allocation8 + $0x20] sm:$0xff] %vm131_vm0, %v297_v59 }
 0x287   :  { %v325_v1 = vrot.slane %v324_v61, 2  ;;  %v330_v2 = vrot.slane %v329_v63, 4  ;;  %v278_v3 = vpop.permute.xlu1 %277  ;;  %v320_v17 = vrot.slane %v319_v5, 1 }
 0x288   :  { %v298_v6 = vmul.f32 %v278_v3, %v71_v62 }
 0x289   :  { %v326_v8 = vadd.f32 %v325_v1, %v324_v61  ;;  %v331_v9 = vadd.f32 %v330_v2, %v329_v63 }
 0x28a   :  { %v336_v11 = vsel %vm131_vm0, %v298_v6, 0.0  ;;  %379 = vst.msk [vmem:[#allocation8 + $0x28] sm:$0xff] %vm131_vm0, %v298_v6 }
 0x28b   :  { %v332_v13 = vrot.slane %v331_v9, 2  ;;  %v337_v14 = vrot.slane %v336_v11, 4  ;;  %v292_v15 = vpop.permute.xlu1 %291  ;;  %v327_v20 = vrot.slane %v326_v8, 1 }
 0x28c   :  { %v300_v18 = vmul.f32 %v292_v15, %v73_v10 }
 0x28d   :  { %v333_v21 = vadd.f32 %v332_v13, %v331_v9  ;;  %v338_v22 = vadd.f32 %v337_v14, %v336_v11 }
 0x28e   :  { %v350_v23 = vsel %vm131_vm0, %v300_v18, 0.0  ;;  %381 = vst.msk [vmem:[#allocation8 + $0x38] sm:$0xff] %vm131_vm0, %v300_v18 }
 0x28f   :  { %v334_v25 = vrot.slane %v333_v21, 1  ;;  %v339_v26 = vrot.slane %v338_v22, 2  ;;  %v351_v27 = vrot.slane %v350_v23, 4 }
 0x290   :  { %500 = shalt.err (!%p497_p0)
}
 0x291   :  { %404 = dma.vmem_to_hbm [thread:$0]  %s399_s1, 1024, %s709_s5, [#allocation9], %s558_s24, %s558_s24, %s559_s25   ;;  %v347_v28 = vadd.f32 %v346_v16, %v345_v4  ;;  %v321_v29 = vadd.f32 %v320_v17, %v319_v5 }
 0x292   :  { %s509_s8 = scalar_lea.vmem %s412_s28, 128  ;;  %p514_p2 = scmp.lt.s32.totalorder %s412_s28, %s412_s28 }
 0x293   :  { %p510_p1 = scmp.ne.s32.totalorder %s412_s28, %s509_s8  ;;  %p515_p3 = scmp.lt.s32.totalorder %s509_s8, %s509_s8 }
 0x295   :  { %p516_p4 = por %p515_p3, %p514_p2 }
 0x297   :  { %p517_p5 = pnand %p516_p4, %p510_p1 }
 0x299   :  { %520 = shalt.err (!%p517_p5)
}
 0x29a   :  { %414 = dma.vmem_to_hbm [thread:$0]  %s412_s28, 128, %s710_s6, [#allocation9]   ;;  %v307_v30 = vadd.f32 %v306_v19, %v305_v7  ;;  %v328_v31 = vadd.f32 %v327_v20, %v326_v8  ;;  %v340_v32 = vadd.f32 %v339_v26, %v338_v22  ;;  %v352_v33 = vadd.f32 %v351_v27, %v350_v23 }
 0x29b   :  { %v335_v34 = vadd.f32 %v334_v25, %v333_v21  ;;  %v348_v36 = vrot.slane %v347_v28, 1  ;;  %s564_s5 = smov [#allocation7]  }
 0x29c   :  { %v365_v35 = vsel %vm202_vm1, %v314_v24, %v307_v30  ;;  %v341_v37 = vrot.slane %v340_v32, 1  ;;  %v353_v38 = vrot.slane %v352_v33, 2  ;;  %s389_s6 = sshll.u32 %s564_s5, 4  ;;  %s390_s6 = int_to_ptr.vmem [resolvable:$true] %s389_s6 }
 0x29d   :  { %v366_v39 = vsel %vm204_vm2, %v321_v29, %v365_v35  ;;  %v349_v46 = vadd.f32 %v348_v36, %v347_v28  ;;  %s529_s24 = scalar_lea.vmem %s390_s6, 128  ;;  %p534_p7 = scmp.lt.s32.totalorder %s390_s6, %s390_s6 }
 0x29e   :  { %v367_v40 = vsel %vm206_vm3, %v328_v31, %v366_v39  ;;  %v342_v41 = vadd.f32 %v341_v37, %v340_v32  ;;  %v354_v42 = vadd.f32 %v353_v38, %v352_v33  ;;  %p530_p6 = scmp.ne.s32.totalorder %s390_s6, %s529_s24  ;;  %p535_p8 = scmp.lt.s32.totalorder %s529_s24, %s529_s24 }
 0x29f   :  { %v368_v43 = vsel %vm208_vm4, %v335_v34, %v367_v40 }
 0x2a0   :  { %v355_v44 = vrot.slane %v354_v42, 1  ;;  %v369_v45 = vsel %vm210_vm5, %v342_v41, %v368_v43  ;;  %p536_p9 = por %p535_p8, %p534_p7 }
 0x2a1   :  { %v370_v48 = vsel %vm212_vm6, %v349_v46, %v369_v45 }
 0x2a2   :  { %v356_v47 = vadd.f32 %v355_v44, %v354_v42  ;;  %p537_p10 = pnand %p536_p9, %p530_p6 }
 0x2a4   :  { %v371_v49 = vsel %vm214_vm7, %v356_v47, %v370_v48 }
 0x2a5   :  { %373 = vst.msk [vmem:[#allocation7] sm:$0xff] %vm131_vm0, %v371_v49 }
 0x2a6   :  { %540 = shalt.err (!%p537_p10)
}
 0x2a7   :  { %392 = dma.vmem_to_hbm [thread:$0]  %s390_s6, 128, %s708_s4, [#allocation4]  }
 0x2a8   :  { %553 = dma.done.wait [#allocation4], 128  }
 0x2a9   :  { %554 = vsyncadd [#allocation4], 4294967168 }
 0x2aa   :  { %555 = dma.done.wait [#allocation9], 1152  }
 0x2ab   :  { %556 = vsyncadd [#allocation9], 4294966144 }
 0x2ac   :  { %424 = vsyncpa [#allocation3], 1 }
 0x2ad   :  { %425 = vsyncpa [#allocation6], 1 }
 0x2ae   :  { %426 = vsyncpa [#allocation4], 1 }
 0x2af   :  { %427 = vsyncpa [#allocation9], 1 }

</bundles_post_ra>
